<compile_context>
chip_gen: v7x
topology: tpu7x:2x2x1
jax: 0.10.0
libtpu: 0.0.40
codegen_flags: <defaults>
</compile_context>

<pallas_src>
import functools

import jax
import jax.numpy as jnp
from jax.experimental import pallas as pl
from jax.experimental.pallas import tpu as pltpu


def _conv_ibn_relu_kernel(x_ref, w_ref, b_ref, o_ref, *,
                          N, P, Cb, eps, with_ibn, with_relu):
    """Fused Conv(im2col matmul) + IBNorm + ReLU; whole problem resident in VMEM.

    x_ref: (Kc_pad, N*P)   im2col patches, k = (kh*KW + kw)*Cin + cin on sublanes,
                           flattened (n, ho, wo) on lanes.
    w_ref: (Cout, Kc_pad)  repacked conv weight.
    b_ref: (Cout, 1)       conv bias (f32).
    o_ref: (N, Cout, P)    output; P = Ho*Wo on the lane axis (maps to NCHW).
    """
    Cout = o_ref.shape[1]

    # ---- convolution: a single MXU matmul, f32 accumulation; bias added once ----
    y = jnp.dot(w_ref[...], x_ref[...],
                preferred_element_type=jnp.float32)           # (Cout, N*P) f32
    y = y + b_ref[...]                                        # hoisted bias add

    if with_ibn:
        # Per-channel batch statistics (over all N*H*W lanes, biased variance).
        # Channels occupy one sublane tile, so reducing all Cout channels costs the
        # same vregs as reducing only the BatchNorm half; BN-vs-IN selection is done
        # on tiny (Cout, 1) stat vectors with a sublane iota (cheap VPU select).
        ch = jax.lax.broadcasted_iota(jnp.int32, (Cout, 1), 0)
        use_bn = ch < Cb
        bm = jnp.mean(y, axis=1, keepdims=True)               # (Cout, 1) batch mean
        bv = jnp.mean((y - bm) ** 2, axis=1, keepdims=True)   # (Cout, 1) batch var

    # Short static unroll over the batch: each slice is a 128-lane-aligned window of
    # the matmul result; only cheap VPU/XLU/EUP work lives here (the conv matmul and
    # the batch statistics are hoisted above).
    for n in range(N):
        yn = y[:, n * P:(n + 1) * P]                          # (Cout, P)
        if with_ibn:
            im = jnp.mean(yn, axis=1, keepdims=True)          # (Cout, 1) instance mean
            mean_n = jnp.where(use_bn, bm, im)                # select on (Cout, 1)
            cn = yn - mean_n
            iv = jnp.mean(cn * cn, axis=1, keepdims=True)     # (Cout, 1) instance var
            var_n = jnp.where(use_bn, bv, iv)
            yn = cn * jax.lax.rsqrt(var_n + eps)
        if with_relu:
            yn = jnp.maximum(yn, 0.0)
        o_ref[n] = yn.astype(o_ref.dtype)


def conv2d_ibnorm_relu(x_nchw, weight_oihw, bias, *, padding=1,
                       with_ibn=True, with_relu=True, eps=1e-5,
                       matmul_dtype=jnp.float32):
    """NCHW in / NCHW out, like the PyTorch module (stride=1, dilation=1, groups=1).

    matmul_dtype: dtype of the MXU operands (jnp.bfloat16 recommended on v6e/v7x);
                  accumulation and IBNorm statistics are always f32.
    """
    N, Cin, H, W = x_nchw.shape
    Cout, Cin_w, KH, KW = weight_oihw.shape
    assert Cin == Cin_w
    Ho = H + 2 * padding - KH + 1
    Wo = W + 2 * padding - KW + 1
    P = Ho * Wo
    Kc = KH * KW * Cin
    Kc_pad = ((Kc + 7) // 8) * 8          # pad contraction dim to a sublane multiple

    # ---- wrapper-side layout glue (no compute): im2col, weight repack, zero pad ----
    xp = jnp.pad(x_nchw.astype(jnp.float32),
                 ((0, 0), (0, 0), (padding, padding), (padding, padding)))
    cols = []
    for kh in range(KH):
        for kw in range(KW):
            win = xp[:, :, kh:kh + Ho, kw:kw + Wo].reshape(N, Cin, P)
            cols.append(jnp.transpose(win, (1, 0, 2)).reshape(Cin, N * P))
    patches = jnp.concatenate(cols, axis=0)                   # (Kc, N*P)
    patches = jnp.pad(patches, ((0, Kc_pad - Kc), (0, 0))).astype(matmul_dtype)

    w2 = jnp.transpose(weight_oihw, (0, 2, 3, 1)).reshape(Cout, Kc)
    w2 = jnp.pad(w2.astype(jnp.float32),
                 ((0, 0), (0, Kc_pad - Kc))).astype(matmul_dtype)
    b2 = bias.reshape(Cout, 1).astype(jnp.float32)

    kernel = functools.partial(
        _conv_ibn_relu_kernel,
        N=N, P=P, Cb=Cout // 2, eps=eps,
        with_ibn=with_ibn, with_relu=with_relu)

    out_bytes = N * Cout * P * 4
    in_bytes = (patches.size * patches.dtype.itemsize
                + w2.size * w2.dtype.itemsize + b2.size * 4)
    cost = pl.CostEstimate(
        flops=2 * Cout * Kc_pad * N * P + 10 * Cout * N * P,
        transcendentals=0,
        bytes_accessed=in_bytes + out_bytes)
    # Whole problem resident + double-buffered full-array specs; clamp below the
    # smallest physical VMEM (v7x: 64 MiB per TensorCore).
    vmem_limit = int(min(64 * 1024 * 1024,
                         max(16 * 1024 * 1024,
                             2 * (in_bytes + out_bytes) + (2 << 20))))

    out = pl.pallas_call(
        kernel,
        out_shape=jax.ShapeDtypeStruct((N, Cout, P), jnp.float32),
        grid=(1,),
        in_specs=[
            pl.BlockSpec((Kc_pad, N * P), lambda i: (0, 0)),
            pl.BlockSpec((Cout, Kc_pad), lambda i: (0, 0)),
            pl.BlockSpec((Cout, 1), lambda i: (0, 0)),
        ],
        out_specs=pl.BlockSpec((N, Cout, P), lambda i: (0, 0, 0)),
        compiler_params=pltpu.CompilerParams(
            dimension_semantics=("arbitrary",),
            vmem_limit_bytes=vmem_limit),
        cost_estimate=cost,
    )(patches, w2, b2)

    # (N, Cout, Ho*Wo) is already NCHW order -> pure reshape, no transpose.
    return out.reshape(N, Cout, Ho, Wo)


def _reference(x_nchw, weight_oihw, bias, *, padding=1, eps=1e-5):
    """Pure-JAX reference matching the PyTorch forward (training-mode BN)."""
    y = jax.lax.conv_general_dilated(
        x_nchw, weight_oihw, window_strides=(1, 1),
        padding=((padding, padding), (padding, padding)),
        dimension_numbers=('NCHW', 'OIHW', 'NCHW'))
    y = y + bias[None, :, None, None]
    Cout = weight_oihw.shape[0]
    Cb = Cout // 2
    bn = y[:, :Cb]
    m = bn.mean(axis=(0, 2, 3), keepdims=True)
    v = ((bn - m) ** 2).mean(axis=(0, 2, 3), keepdims=True)
    bn_o = (bn - m) / jnp.sqrt(v + eps)
    ins = y[:, Cb:]
    m2 = ins.mean(axis=(2, 3), keepdims=True)
    v2 = ((ins - m2) ** 2).mean(axis=(2, 3), keepdims=True)
    in_o = (ins - m2) / jnp.sqrt(v2 + eps)
    return jnp.maximum(jnp.concatenate([bn_o, in_o], axis=1), 0.0)


if __name__ == "__main__":
    # Small shapes consistent with the module: in_channels=4, out_channels=8,
    # kernel_size=3, stride=1, padding=1, batch=2, spatial=16.
    key = jax.random.PRNGKey(0)
    kx, kw, kb = jax.random.split(key, 3)

    N, Cin, H, W = 2, 4, 16, 16
    Cout, K = 8, 3

    x = jax.random.normal(kx, (N, Cin, H, W), dtype=jnp.float32)
    weight = 0.1 * jax.random.normal(kw, (Cout, Cin, K, K), dtype=jnp.float32)
    bias = 0.1 * jax.random.normal(kb, (Cout,), dtype=jnp.float32)

    ref = jax.block_until_ready(_reference(x, weight, bias, padding=1))

    # f32 MXU operands: exact path, tight tolerance.
    out = conv2d_ibnorm_relu(x, weight, bias, padding=1, matmul_dtype=jnp.float32)
    out = jax.block_until_ready(out)
    assert out.shape == (N, Cout, H, W), out.shape
    assert jnp.allclose(out, ref, atol=2e-3, rtol=2e-3), (
        float(jnp.max(jnp.abs(out - ref))))

    # bf16 MXU operands (recommended on v6e/v7x): f32 accumulation + f32 stats keep
    # the error at the bf16 input-rounding level; use a matching looser tolerance.
    out_bf16 = conv2d_ibnorm_relu(x, weight, bias, padding=1,
                                  matmul_dtype=jnp.bfloat16)
    out_bf16 = jax.block_until_ready(out_bf16)
    assert jnp.allclose(out_bf16, ref, atol=3e-2, rtol=3e-2), (
        float(jnp.max(jnp.abs(out_bf16 - ref))))

    print("KERNEL_OK")
</pallas_src>

<mosaic_0001>
module attributes {stable_mosaic.version = 11 : i64} {
  func.func @_conv_ibn_relu_kernel(%arg0: i32, %arg1: memref<40x512xf32, #tpu.memory_space<vmem>>, %arg2: memref<8x40xf32, #tpu.memory_space<vmem>>, %arg3: memref<8x1xf32, #tpu.memory_space<vmem>>, %arg4: memref<2x8x256xf32, #tpu.memory_space<vmem>>) attributes {dimension_semantics = [#tpu.dimension_semantics<arbitrary>], iteration_bounds = array<i64: 1>, scalar_prefetch = 0 : i64, scratch_operands = 0 : i64, tpu.core_type = #tpu.core_type<tc>, window_params = [{pipeline_mode = #tpu.pipeline_mode<synchronous>, transform_indices = @transform_0, window_bounds = array<i64: 40, 512>}, {pipeline_mode = #tpu.pipeline_mode<synchronous>, transform_indices = @transform_1, window_bounds = array<i64: 8, 40>}, {pipeline_mode = #tpu.pipeline_mode<synchronous>, transform_indices = @transform_2, window_bounds = array<i64: 8, 1>}, {pipeline_mode = #tpu.pipeline_mode<synchronous>, transform_indices = @transform_3, window_bounds = array<i64: 2, 8, 256>}]} {
    %c0 = arith.constant 0 : index
    %c0_0 = arith.constant 0 : index
    %0 = vector.load %arg2[%c0, %c0_0] : memref<8x40xf32, #tpu.memory_space<vmem>>, vector<8x40xf32>
    %c0_1 = arith.constant 0 : index
    %c0_2 = arith.constant 0 : index
    %1 = vector.load %arg1[%c0_1, %c0_2] : memref<40x512xf32, #tpu.memory_space<vmem>>, vector<40x512xf32>
    %cst = arith.constant dense<0.000000e+00> : vector<8x512xf32>
    %2 = tpu.matmul %0, %1, %cst {dimension_numbers = #tpu.dot_dimension_numbers<[1], [0], [0], [1], [0, 0, 1, 1], [], []>} : vector<8x40xf32>, vector<40x512xf32>, vector<8x512xf32> -> vector<8x512xf32>
    %c0_3 = arith.constant 0 : index
    %c0_4 = arith.constant 0 : index
    %3 = vector.load %arg3[%c0_3, %c0_4] : memref<8x1xf32, #tpu.memory_space<vmem>>, vector<8x1xf32>
    %4 = vector.broadcast %3 : vector<8x1xf32> to vector<8x512xf32>
    %5 = arith.addf %2, %4 : vector<8x512xf32>
    %6 = tpu.iota {dimensions = array<i32: 0>} : vector<8x1xi32>
    %c4_i32 = arith.constant 4 : i32
    %7 = vector.broadcast %c4_i32 : i32 to vector<8x1xi32>
    %8 = arith.cmpi slt, %6, %7 : vector<8x1xi32>
    %cst_5 = arith.constant dense<0.000000e+00> : vector<8xf32>
    %9 = vector.multi_reduction <add>, %5, %cst_5 [1] : vector<8x512xf32> to vector<8xf32>
    %10 = vector.shape_cast %9 : vector<8xf32> to vector<8x1xf32>
    %cst_6 = arith.constant 5.120000e+02 : f32
    %11 = vector.broadcast %cst_6 : f32 to vector<8x1xf32>
    %12 = arith.divf %10, %11 : vector<8x1xf32>
    %13 = vector.broadcast %12 : vector<8x1xf32> to vector<8x512xf32>
    %14 = arith.subf %5, %13 : vector<8x512xf32>
    %15 = arith.mulf %14, %14 : vector<8x512xf32>
    %cst_7 = arith.constant dense<0.000000e+00> : vector<8xf32>
    %16 = vector.multi_reduction <add>, %15, %cst_7 [1] : vector<8x512xf32> to vector<8xf32>
    %17 = vector.shape_cast %16 : vector<8xf32> to vector<8x1xf32>
    %cst_8 = arith.constant 5.120000e+02 : f32
    %18 = vector.broadcast %cst_8 : f32 to vector<8x1xf32>
    %19 = arith.divf %17, %18 : vector<8x1xf32>
    %20 = vector.extract_strided_slice %5 {offsets = [0, 0], sizes = [8, 256], strides = [1, 1]} : vector<8x512xf32> to vector<8x256xf32>
    %cst_9 = arith.constant dense<0.000000e+00> : vector<8xf32>
    %21 = vector.multi_reduction <add>, %20, %cst_9 [1] : vector<8x256xf32> to vector<8xf32>
    %22 = vector.shape_cast %21 : vector<8xf32> to vector<8x1xf32>
    %cst_10 = arith.constant 2.560000e+02 : f32
    %23 = vector.broadcast %cst_10 : f32 to vector<8x1xf32>
    %24 = arith.divf %22, %23 : vector<8x1xf32>
    %25 = arith.select %8, %12, %24 : vector<8x1xi1>, vector<8x1xf32>
    %26 = vector.broadcast %25 : vector<8x1xf32> to vector<8x256xf32>
    %27 = arith.subf %20, %26 : vector<8x256xf32>
    %28 = arith.mulf %27, %27 : vector<8x256xf32>
    %cst_11 = arith.constant dense<0.000000e+00> : vector<8xf32>
    %29 = vector.multi_reduction <add>, %28, %cst_11 [1] : vector<8x256xf32> to vector<8xf32>
    %30 = vector.shape_cast %29 : vector<8xf32> to vector<8x1xf32>
    %cst_12 = arith.constant 2.560000e+02 : f32
    %31 = vector.broadcast %cst_12 : f32 to vector<8x1xf32>
    %32 = arith.divf %30, %31 : vector<8x1xf32>
    %33 = arith.select %8, %19, %32 : vector<8x1xi1>, vector<8x1xf32>
    %cst_13 = arith.constant 9.99999974E-6 : f32
    %34 = vector.broadcast %cst_13 : f32 to vector<8x1xf32>
    %35 = arith.addf %33, %34 : vector<8x1xf32>
    %36 = math.rsqrt %35 : vector<8x1xf32>
    %37 = vector.broadcast %36 : vector<8x1xf32> to vector<8x256xf32>
    %38 = arith.mulf %27, %37 : vector<8x256xf32>
    %cst_14 = arith.constant 0.000000e+00 : f32
    %39 = vector.broadcast %cst_14 : f32 to vector<8x256xf32>
    %40 = arith.maximumf %38, %39 : vector<8x256xf32>
    %c0_15 = arith.constant 0 : index
    %c0_16 = arith.constant 0 : index
    %c0_17 = arith.constant 0 : index
    %41 = vector.load %arg4[%c0_15, %c0_16, %c0_17] : memref<2x8x256xf32, #tpu.memory_space<vmem>>, vector<1x8x256xf32>
    %42 = vector.shape_cast %41 : vector<1x8x256xf32> to vector<8x256xf32>
    %43 = vector.shape_cast %40 : vector<8x256xf32> to vector<1x8x256xf32>
    tpu.vector_store %arg4[%c0_15, %c0_16, %c0_17], %43 {strides = array<i32>} : memref<2x8x256xf32, #tpu.memory_space<vmem>>, vector<1x8x256xf32>,
    %44 = vector.extract_strided_slice %5 {offsets = [0, 256], sizes = [8, 256], strides = [1, 1]} : vector<8x512xf32> to vector<8x256xf32>
    %cst_18 = arith.constant dense<0.000000e+00> : vector<8xf32>
    %45 = vector.multi_reduction <add>, %44, %cst_18 [1] : vector<8x256xf32> to vector<8xf32>
    %46 = vector.shape_cast %45 : vector<8xf32> to vector<8x1xf32>
    %cst_19 = arith.constant 2.560000e+02 : f32
    %47 = vector.broadcast %cst_19 : f32 to vector<8x1xf32>
    %48 = arith.divf %46, %47 : vector<8x1xf32>
    %49 = arith.select %8, %12, %48 : vector<8x1xi1>, vector<8x1xf32>
    %50 = vector.broadcast %49 : vector<8x1xf32> to vector<8x256xf32>
    %51 = arith.subf %44, %50 : vector<8x256xf32>
    %52 = arith.mulf %51, %51 : vector<8x256xf32>
    %cst_20 = arith.constant dense<0.000000e+00> : vector<8xf32>
    %53 = vector.multi_reduction <add>, %52, %cst_20 [1] : vector<8x256xf32> to vector<8xf32>
    %54 = vector.shape_cast %53 : vector<8xf32> to vector<8x1xf32>
    %cst_21 = arith.constant 2.560000e+02 : f32
    %55 = vector.broadcast %cst_21 : f32 to vector<8x1xf32>
    %56 = arith.divf %54, %55 : vector<8x1xf32>
    %57 = arith.select %8, %19, %56 : vector<8x1xi1>, vector<8x1xf32>
    %cst_22 = arith.constant 9.99999974E-6 : f32
    %58 = vector.broadcast %cst_22 : f32 to vector<8x1xf32>
    %59 = arith.addf %57, %58 : vector<8x1xf32>
    %60 = math.rsqrt %59 : vector<8x1xf32>
    %61 = vector.broadcast %60 : vector<8x1xf32> to vector<8x256xf32>
    %62 = arith.mulf %51, %61 : vector<8x256xf32>
    %cst_23 = arith.constant 0.000000e+00 : f32
    %63 = vector.broadcast %cst_23 : f32 to vector<8x256xf32>
    %64 = arith.maximumf %62, %63 : vector<8x256xf32>
    %c1 = arith.constant 1 : index
    %c0_24 = arith.constant 0 : index
    %c0_25 = arith.constant 0 : index
    %65 = vector.load %arg4[%c1, %c0_24, %c0_25] : memref<2x8x256xf32, #tpu.memory_space<vmem>>, vector<1x8x256xf32>
    %66 = vector.shape_cast %65 : vector<1x8x256xf32> to vector<8x256xf32>
    %67 = vector.shape_cast %64 : vector<8x256xf32> to vector<1x8x256xf32>
    tpu.vector_store %arg4[%c1, %c0_24, %c0_25], %67 {strides = array<i32>} : memref<2x8x256xf32, #tpu.memory_space<vmem>>, vector<1x8x256xf32>,
    return
  }
  func.func @transform_0(%arg0: i32) -> (i32, i32) {
    %c0_i32 = arith.constant 0 : i32
    %c0_i32_0 = arith.constant 0 : i32
    %c0_i32_1 = arith.constant 0 : i32
    return %c0_i32, %c0_i32_0 : i32, i32
  }
  func.func @transform_1(%arg0: i32) -> (i32, i32) {
    %c0_i32 = arith.constant 0 : i32
    %c0_i32_0 = arith.constant 0 : i32
    %c0_i32_1 = arith.constant 0 : i32
    return %c0_i32, %c0_i32_0 : i32, i32
  }
  func.func @transform_2(%arg0: i32) -> (i32, i32) {
    %c0_i32 = arith.constant 0 : i32
    %c0_i32_0 = arith.constant 0 : i32
    %c0_i32_1 = arith.constant 0 : i32
    return %c0_i32, %c0_i32_0 : i32, i32
  }
  func.func @transform_3(%arg0: i32) -> (i32, i32, i32) {
    %c0_i32 = arith.constant 0 : i32
    %c0_i32_0 = arith.constant 0 : i32
    %c0_i32_1 = arith.constant 0 : i32
    %c0_i32_2 = arith.constant 0 : i32
    return %c0_i32, %c0_i32_0, %c0_i32_1 : i32, i32, i32
  }
}

</mosaic_0001>

<bundles_post_ra>
// kernel: tpu_custom_call.1
= control target key start
LH: loop header
LB: loop body
LE: loop exit
PB: predicated region body
PF: predicated region fallthrough
CT: control target
= control target key end

     0   :  { %8 = vsyncpa [#allocation3], 0  ;;  %s429_s0 = inlined_call_operand.hbm [shape: f32[40,512], index: 0, kind: input, shape index: {}]   ;;  %s430_s1 = inlined_call_operand.vmem [shape: f32[8,40], index: 1, kind: input, shape index: {}]   ;;  %s431_s2 = inlined_call_operand.vmem [shape: f32[8,1], index: 2, kind: input, shape index: {}]   ;;  %s432_s3 = inlined_call_operand.hbm [shape: f32[2,8,256], index: 3, kind: output, shape index: {}]  }
   0x1   :  { %9 = vsyncpa [#allocation4], 0  ;;  %s367_s12 = smov [#allocation2]   ;;  %s319_s16 = scalar_lea.hbm %s429_s0, 2560 }
   0x2   :  { %s15_s13 = sshll.u32 %s367_s12, 4  ;;  %p320_p0 = scmp.ne.s32.totalorder %s429_s0, %s319_s16  ;;  %s16_s13 = int_to_ptr.vmem [resolvable:$true] %s15_s13 }
   0x3   :  { %p323_p1 = scmp.lt.u32.totalorder %s319_s16, %s429_s0 }
   0x5   :  { %p325_p2 = pnand %p323_p1, %p320_p0 }
   0x7   :  { %328 = shalt.err (!%p325_p2)
}
   0x8   :  { %s329_s21 = scalar_lea.vmem %s16_s13, 2560  ;;  %p334_p4 = scmp.lt.s32.totalorder %s16_s13, %s16_s13 }
   0x9   :  { %p330_p3 = scmp.ne.s32.totalorder %s16_s13, %s329_s21  ;;  %p335_p5 = scmp.lt.s32.totalorder %s329_s21, %s329_s21 }
   0xb   :  { %p336_p6 = por %p335_p5, %p334_p4 }
   0xd   :  { %p337_p7 = pnand %p336_p6, %p330_p3 }
   0xf   :  { %340 = shalt.err (!%p337_p7)
}
  0x10   :  { %s368_s22 = smov 512   ;;  %s369_s23 = smov 32  }
  0x11   :  { %21 = dma.hbm_to_vmem [thread:$0]  %s429_s0, 2560, %s16_s13, [#allocation3], %s368_s22, %s368_s22, %s369_s23  }
  0x12   :  { %363 = dma.done.wait [#allocation3], 2560  }
  0x13   :  { %364 = vsyncadd [#allocation3], 4294964736  ;;  %v370_v0 = vmov 0.0   ;;  %v371_v1 = vmov 0   ;;  %v31_v2 = vld [vmem:[#allocation2 + $0x8] sm:$0xff]  ;;  %v33_v4 = vld [vmem:[#allocation2 + $0x18] sm:$0xff]  ;;  %v202_v45 = vlaneseq }
  0x14   :  { %124 = vmatprep.mubr.f32.mxu0 %v370_v0  ;;  %195 = vmatprep.mubr.f32.mxu1 %v370_v0  ;;  %v35_v3 = vld [vmem:[#allocation2 + $0x28] sm:$0xff]  ;;  %v37_v6 = vld [vmem:[#allocation2 + $0x38] sm:$0xff]  ;;  %v30_v7 = vld [vmem:[#allocation2] sm:$0xff]  ;;  %vm56_vm0 = vcmask 326656  }
  0x15   :  { %314 = vset.pattern.permute.xlu0 %v371_v1  ;;  %v290_v5 = vpack.c.bf16 %v35_v3, %v31_v2  ;;  %v34_v8 = vld [vmem:[#allocation2 + $0x20] sm:$0xff]  ;;  %v298_v9 = vpack.c.bf16 %v37_v6, %v33_v4  ;;  %v32_v11 = vld [vmem:[#allocation2 + $0x10] sm:$0xff]  ;;  %v39_v13 = vld [vmem:[#allocation2 + $0x48] sm:$0xff]  ;;  %v203_v47 = vshrl.u32 %v202_v45, 7 }
  0x16   :  { %v292_v10 = vpack.c.bf16 %v34_v8, %v30_v7  ;;  %v36_v12 = vld [vmem:[#allocation2 + $0x30] sm:$0xff]  ;;  %v43_v15 = vld [vmem:[#allocation2 + $0x68] sm:$0xff]  ;;  %v41_v16 = vld [vmem:[#allocation2 + $0x58] sm:$0xff] }
  0x17   :  { %291 = vmatprep.subr.bf16.mxu0 %v290_v5  ;;  %v300_v14 = vpack.c.bf16 %v36_v12, %v32_v11  ;;  %v45_v17 = vld [vmem:[#allocation2 + $0x78] sm:$0xff]  ;;  %299 = vmatprep.subr.bf16.mxu1 %v298_v9  ;;  %v294_v18 = vpack.c.bf16 %v43_v15, %v39_v13  ;;  %v38_v20 = vld [vmem:[#allocation2 + $0x40] sm:$0xff]  ;;  %v40_v22 = vld [vmem:[#allocation2 + $0x50] sm:$0xff]  ;;  %vm204_vm1 = vcmp.lt.s32.totalorder %v203_v47, 4 }
  0x18   :  { %293 = vmatpush1.bf16.msra.mxu0 %v292_v10  ;;  %v302_v19 = vpack.c.bf16 %v45_v17, %v41_v16  ;;  %v42_v21 = vld [vmem:[#allocation2 + $0x60] sm:$0xff]  ;;  %v44_v24 = vld [vmem:[#allocation2 + $0x70] sm:$0xff]  ;;  %v47_v26 = vld [vmem:[#allocation2 + $0x88] sm:$0xff] }
  0x19   :  { %301 = vmatpush1.bf16.msra.mxu1 %v300_v14  ;;  %v296_v23 = vpack.c.bf16 %v42_v21, %v38_v20  ;;  %295 = vmatprep.subr.bf16.mxu0 %v294_v18  ;;  %v304_v25 = vpack.c.bf16 %v44_v24, %v40_v22  ;;  %v49_v27 = vld [vmem:[#allocation2 + $0x98] sm:$0xff]  ;;  %v50_v28 = vld [vmem:[%s431_s2] sm:$0xff]  ;;  %v48_v30 = vld [vmem:[#allocation2 + $0x90] sm:$0xff] }
  0x1a   :  { %303 = vmatprep.subr.bf16.mxu1 %v302_v19  ;;  %53 = vperm.xlu0 %314, %v50_v28   ;;  %v46_v29 = vld [vmem:[#allocation2 + $0x80] sm:$0xff] }
  0x1b   :  { %v29_v31 = vld [vmem:[%s430_s1] sm:$0xff]  ;;  %s372_s1 = smov [#allocation5]  }
  0x1c   :  { %297 = vmatpush1.bf16.msra.mxu0 %v296_v23  ;;  %s276_s2 = sshll.u32 %s372_s1, 4  ;;  %s277_s2 = int_to_ptr.vmem [resolvable:$true] %s276_s2 }
  0x1d   :  { %305 = vmatpush1.bf16.msra.mxu1 %v304_v25  ;;  %68 = vmatprep.subr.mxu0 %v47_v26  ;;  %s341_s29 = scalar_lea.vmem %s277_s2, 512  ;;  %p346_p9 = scmp.lt.s32.totalorder %s277_s2, %s277_s2 }
  0x1e   :  { %139 = vmatprep.subr.mxu1 %v49_v27  ;;  %p342_p8 = scmp.ne.s32.totalorder %s277_s2, %s341_s29  ;;  %p347_p10 = scmp.lt.s32.totalorder %s341_s29, %s341_s29 }
  0x20   :  { %69 = vmatpush1.msra.mxu0 %v46_v29  ;;  %p348_p11 = por %p347_p10, %p346_p9 }
  0x21   :  { %140 = vmatpush1.msra.mxu1 %v48_v30  ;;  %288 = vmatmul.mubr.msk.f32.vlgmr.msra.gmra.mrb[0].mxu0 %vm56_vm0, %v29_v31 }
  0x22   :  { %289 = vmatmul.mubr.msk.f32.vlgmr.msra.gmra.mrb[0].mxu1 %vm56_vm0, %v29_v31  ;;  %p349_p12 = pnand %p348_p11, %p342_p8 }
  0x99   :  { %v54_v32 = vpop.permute.xlu0 %53 }
  0xf4   :  { %v126_v33 = vpop.f32.mrb[0].mxu0 }
  0xf5   :  { %v127_v34 = vadd.f32 %v126_v33, %v54_v32  ;;  %v197_v35 = vpop.f32.mrb[0].mxu1  ;;  %v128_v36 = vpop.f32.mrb[1].mxu0 }
  0xf6   :  { %v129_v37 = vadd.f32 %v128_v36, %v54_v32  ;;  %v199_v38 = vpop.f32.mrb[1].mxu1  ;;  %v198_v39 = vadd.f32 %v197_v35, %v54_v32 }
  0xf7   :  { %v200_v40 = vadd.f32 %v199_v38, %v54_v32 }
  0xf8   :  { %v205_v41 = vadd.f32 %v129_v37, %v127_v34 }
  0xf9   :  { %v248_v43 = vadd.f32 %v200_v40, %v198_v39 }
  0xfa   :  { %226 = vadd.xlane.f32.xlu1 %v205_v41  ;;  %v206_v42 = vadd.f32 %v205_v41, %v198_v39 }
  0xfc   :  { %v207_v44 = vadd.f32 %v206_v42, %v200_v40 }
  0xfe   :  { %249 = vadd.xlane.f32.xlu1 %v248_v43  ;;  %208 = vadd.xlane.f32.xlu0 %v207_v44 }
 0x187   :  { %v227_v46 = vpop.xlane.xlu1 %226 }
 0x188   :  { %v229_v50 = vmul.f32 0.00390625, %v227_v46 }
 0x18b   :  { %v250_v48 = vpop.xlane.xlu1 %249  ;;  %v209_v49 = vpop.xlane.xlu0 %208 }
 0x18c   :  { %v251_v51 = vmul.f32 0.00390625, %v250_v48  ;;  %v211_v52 = vmul.f32 0.001953125, %v209_v49 }
 0x18e   :  { %v230_v53 = vsel %vm204_vm1, %v211_v52, %v229_v50  ;;  %v212_v54 = vsub.f32 %v127_v34, %v211_v52  ;;  %v213_v55 = vsub.f32 %v129_v37, %v211_v52  ;;  %v214_v56 = vsub.f32 %v198_v39, %v211_v52 }
 0x18f   :  { %v231_v57 = vsub.f32 %v127_v34, %v230_v53  ;;  %v232_v58 = vsub.f32 %v129_v37, %v230_v53  ;;  %v215_v59 = vsub.f32 %v200_v40, %v211_v52  ;;  %v252_v62 = vsel %vm204_vm1, %v211_v52, %v251_v51 }
 0x190   :  { %v216_v60 = vmul.f32 %v212_v54, %v212_v54  ;;  %v217_v61 = vmul.f32 %v213_v55, %v213_v55  ;;  %v218_v1 = vmul.f32 %v214_v56, %v214_v56  ;;  %v253_v4 = vsub.f32 %v198_v39, %v252_v62 }
 0x191   :  { %v233_v63 = vmul.f32 %v231_v57, %v231_v57  ;;  %v234_v0 = vmul.f32 %v232_v58, %v232_v58  ;;  %v254_v5 = vsub.f32 %v200_v40, %v252_v62  ;;  %v219_v6 = vmul.f32 %v215_v59, %v215_v59 }
 0x192   :  { %v220_v2 = vadd.f32 %v217_v61, %v216_v60  ;;  %v255_v9 = vmul.f32 %v253_v4, %v253_v4 }
 0x193   :  { %v235_v3 = vadd.f32 %v234_v0, %v233_v63  ;;  %v256_v10 = vmul.f32 %v254_v5, %v254_v5 }
 0x194   :  { %v221_v7 = vadd.f32 %v220_v2, %v218_v1 }
 0x195   :  { %236 = vadd.xlane.f32.xlu1 %v235_v3  ;;  %v257_v11 = vadd.f32 %v256_v10, %v255_v9 }
 0x196   :  { %v222_v8 = vadd.f32 %v221_v7, %v219_v6 }
 0x199   :  { %223 = vadd.xlane.f32.xlu1 %v222_v8 }
 0x19d   :  { %258 = vadd.xlane.f32.xlu1 %v257_v11 }
 0x222   :  { %v237_v12 = vpop.xlane.xlu1 %236 }
 0x223   :  { %v238_v14 = vmul.f32 0.00390625, %v237_v12 }
 0x226   :  { %v224_v13 = vpop.xlane.xlu1 %223 }
 0x227   :  { %v225_v15 = vmul.f32 0.001953125, %v224_v13 }
 0x229   :  { %v239_v16 = vsel %vm204_vm1, %v225_v15, %v238_v14 }
 0x22a   :  { %v240_v17 = vadd.f32 1e-05, %v239_v16  ;;  %v259_v18 = vpop.xlane.xlu1 %258 }
 0x22b   :  { %v260_v19 = vmul.f32 0.00390625, %v259_v18 }
 0x22c   :  { %315 = vrsqrt.f32 %v240_v17 }
 0x22d   :  { %v261_v20 = vsel %vm204_vm1, %v225_v15, %v260_v19 }
 0x22e   :  { %v262_v21 = vadd.f32 1e-05, %v261_v20 }
 0x230   :  { %317 = vrsqrt.f32 %v262_v21 }
 0x236   :  { %v316_v22 = vpop.eup %315 }
 0x237   :  { %v242_v23 = vmul.f32 %v316_v22, %v231_v57  ;;  %v243_v24 = vmul.f32 %v316_v22, %v232_v58 }
 0x239   :  { %v244_v25 = vmax.f32 %v242_v23, 0.0  ;;  %v245_v26 = vmax.f32 %v243_v24, 0.0 }
 0x23a   :  { %v318_v27 = vpop.eup %317 }
 0x23b   :  { %246 = vst [vmem:[#allocation5] sm:$0xff] %v244_v25  ;;  %247 = vst [vmem:[#allocation5 + $0x8] sm:$0xff] %v245_v26  ;;  %v264_v28 = vmul.f32 %v318_v27, %v253_v4  ;;  %v265_v29 = vmul.f32 %v318_v27, %v254_v5 }
 0x23d   :  { %v266_v30 = vmax.f32 %v264_v28, 0.0  ;;  %v267_v31 = vmax.f32 %v265_v29, 0.0 }
 0x23f   :  { %269 = vst [vmem:[#allocation5 + $0x10] sm:$0xff] %v266_v30  ;;  %270 = vst [vmem:[#allocation5 + $0x18] sm:$0xff] %v267_v31 }
 0x240   :  { %352 = shalt.err (!%p349_p12)
}
 0x241   :  { %s353_s5 = scalar_lea.hbm %s432_s3, 512 }
 0x242   :  { %p354_p13 = scmp.ne.s32.totalorder %s432_s3, %s353_s5  ;;  %p357_p0 = scmp.lt.u32.totalorder %s353_s5, %s432_s3 }
 0x244   :  { %p359_p1 = pnand %p357_p0, %p354_p13 }
 0x246   :  { %362 = shalt.err (!%p359_p1)
}
 0x247   :  { %s373_s10 = smov 256   ;;  %s374_s11 = smov 16  }
 0x248   :  { %282 = dma.vmem_to_hbm [thread:$0]  %s277_s2, 512, %s432_s3, [#allocation4], %s373_s10, %s373_s10, %s374_s11  }
 0x249   :  { %365 = dma.done.wait [#allocation4], 512  }
 0x24a   :  { %366 = vsyncadd [#allocation4], 4294966784 }
 0x24b   :  { %286 = vsyncpa [#allocation3], 1 }
 0x24c   :  { %287 = vsyncpa [#allocation4], 1 }

</bundles_post_ra>
